<compile_context>
chip_gen: v7x
topology: tpu7x:2x2x1
jax: 0.10.0
libtpu: 0.0.40
codegen_flags: <defaults>
</compile_context>

<pallas_src>
import jax
import jax.numpy as jnp
from jax.experimental import pallas as pl
from jax.experimental.pallas import tpu as pltpu


def _round_up(x, m):
    return ((x + m - 1) // m) * m


def _linear_kernel_multi_k(x_ref, w_ref, b_ref, o_ref):
    # x_ref: (tm, tk), w_ref: (tk, tn) [pre-transposed], b_ref: (1, tn),
    # o_ref: (tm, tn) f32 -- resident across the K grid axis, used as the
    # accumulator directly (no separate VMEM scratch).
    @pl.when(pl.program_id(2) == 0)
    def _():
        o_ref[...] = jnp.broadcast_to(b_ref[...], o_ref.shape).astype(o_ref.dtype)

    o_ref[...] += jnp.dot(
        x_ref[...], w_ref[...], preferred_element_type=jnp.float32
    )


def _linear_kernel_single_k(x_ref, w_ref, b_ref, o_ref):
    # Whole reduction in one tile: single fused dot + bias write.
    o_ref[...] = (
        jnp.dot(x_ref[...], w_ref[...], preferred_element_type=jnp.float32)
        + b_ref[...]
    ).astype(o_ref.dtype)


def make_linear_forward(weight, bias, *, tm=512, tn=512, tk=512, use_bf16=False):
    """Build a forward fn for torch.nn.Linear semantics: y = x @ W.T + b.

    Weight transpose + padding (and the optional bf16 cast) happen exactly
    once here, not per forward call.
    """
    Out, In = weight.shape
    assert bias.shape == (Out,)
    compute_dtype = jnp.bfloat16 if use_bf16 else weight.dtype

    # Keep TPU layout rules: sublane dims multiples of 8, lane dims multiples
    # of 128 -> lane-dense, unmasked stores.
    tn = min(tn, _round_up(Out, 128))
    tk = min(tk, _round_up(In, 128))
    Kp = _round_up(In, tk)
    Np = _round_up(Out, tn)

    # One-time static parameter prep: transpose to MXU-friendly (In, Out) and
    # zero-pad to tile multiples (padding contributes nothing to the dot).
    wT = weight.T.astype(compute_dtype)
    if (Kp, Np) != (In, Out):
        wT = jnp.pad(wT, ((0, Kp - In), (0, Np - Out)))
    b2 = bias.reshape(1, Out).astype(jnp.float32)
    if Np != Out:
        b2 = jnp.pad(b2, ((0, 0), (0, Np - Out)))

    def forward(x):
        B, In2 = x.shape
        assert In2 == In
        tm_ = min(tm, _round_up(B, 8))
        Mp = _round_up(B, tm_)

        xp = x.astype(compute_dtype)
        if (Mp, Kp) != (B, In):
            xp = jnp.pad(xp, ((0, Mp - B), (0, Kp - In)))

        grid = (Mp // tm_, Np // tn, Kp // tk)
        kernel = _linear_kernel_single_k if grid[2] == 1 else _linear_kernel_multi_k

        in_itemsize = jnp.dtype(compute_dtype).itemsize
        out_p = pl.pallas_call(
            kernel,
            out_shape=jax.ShapeDtypeStruct((Mp, Np), jnp.float32),
            grid_spec=pltpu.PrefetchScalarGridSpec(
                num_scalar_prefetch=0,
                grid=grid,
                in_specs=[
                    # x tile: rows follow M, cols follow K.
                    pl.BlockSpec((tm_, tk), lambda i, j, k: (i, k)),
                    # weight tile (already (In, Out)): rows K, cols N.
                    pl.BlockSpec((tk, tn), lambda i, j, k: (k, j)),
                    # bias tile: depends on the N axis only.
                    pl.BlockSpec((1, tn), lambda i, j, k: (0, j)),
                ],
                out_specs=pl.BlockSpec((tm_, tn), lambda i, j, k: (i, j)),
            ),
            compiler_params=pltpu.CompilerParams(
                # M/N parallel (megacore sharding on v7x), K reduction arbitrary.
                dimension_semantics=("parallel", "parallel", "arbitrary"),
                # ~6 MiB double-buffered footprint at 512^2 f32 tiles; 48 MiB
                # cap leaves headroom yet stays under v7x's 64 MiB physical.
                vmem_limit_bytes=48 * 1024 * 1024,
            ),
            cost_estimate=pl.CostEstimate(
                flops=2 * B * In * Out,
                transcendentals=0,
                bytes_accessed=in_itemsize * (B * In + In * Out)
                + 4 * (Out + B * Out),
            ),
        )(xp, wT, b2)

        out = out_p if (Mp, Np) == (B, Out) else out_p[:B, :Out]
        return out.astype(x.dtype)

    return forward


if __name__ == "__main__":
    key = jax.random.PRNGKey(0)

    # --- Test 1: module's nominal small shapes (single-K fast path) --------
    input_dim, output_dim, batch = 32, 16, 8
    kx, kw, kb, key = jax.random.split(key, 4)
    bound = 1.0 / jnp.sqrt(jnp.float32(input_dim))
    weight = jax.random.uniform(kw, (output_dim, input_dim),
                                minval=-bound, maxval=bound, dtype=jnp.float32)
    bias = jax.random.uniform(kb, (output_dim,),
                              minval=-bound, maxval=bound, dtype=jnp.float32)
    x = jax.random.normal(kx, (batch, input_dim), dtype=jnp.float32)

    fwd = jax.jit(make_linear_forward(weight, bias))
    out = jax.block_until_ready(fwd(x))
    ref = x @ weight.T + bias
    assert out.shape == (batch, output_dim)
    assert jnp.allclose(out, ref, atol=1e-5, rtol=1e-5)

    # --- Test 2: multi-K accumulation path (K grid > 1) ---------------------
    in2, out2, b2 = 256, 128, 16
    kx2, kw2, kb2, key = jax.random.split(key, 4)
    bound2 = 1.0 / jnp.sqrt(jnp.float32(in2))
    weight2 = jax.random.uniform(kw2, (out2, in2),
                                 minval=-bound2, maxval=bound2, dtype=jnp.float32)
    bias2 = jax.random.uniform(kb2, (out2,),
                               minval=-bound2, maxval=bound2, dtype=jnp.float32)
    x2 = jax.random.normal(kx2, (b2, in2), dtype=jnp.float32)

    fwd2 = jax.jit(make_linear_forward(weight2, bias2, tk=128))
    out_2 = jax.block_until_ready(fwd2(x2))
    ref2 = x2 @ weight2.T + bias2
    assert out_2.shape == (b2, out2)
    assert jnp.allclose(out_2, ref2, atol=1e-4, rtol=1e-5)

    # --- Test 3: bf16 input path (v6e/v7x MXU-rate lever), loose tolerance --
    fwd_bf16 = jax.jit(make_linear_forward(weight2, bias2, tk=128, use_bf16=True))
    out_bf16 = jax.block_until_ready(fwd_bf16(x2))
    assert jnp.allclose(out_bf16, ref2, atol=5e-2, rtol=5e-2)

    print("KERNEL_OK")
</pallas_src>

<mosaic_0001>
module attributes {stable_mosaic.version = 11 : i64} {
  func.func @_linear_kernel_single_k(%arg0: i32, %arg1: i32, %arg2: i32, %arg3: memref<8x128xf32, #tpu.memory_space<vmem>>, %arg4: memref<128x128xf32, #tpu.memory_space<vmem>>, %arg5: memref<1x128xf32, #tpu.memory_space<vmem>>, %arg6: memref<8x128xf32, #tpu.memory_space<vmem>>) attributes {dimension_semantics = [#tpu.dimension_semantics<parallel>, #tpu.dimension_semantics<parallel>, #tpu.dimension_semantics<arbitrary>], iteration_bounds = array<i64: 1, 1, 1>, scalar_prefetch = 0 : i64, scratch_operands = 0 : i64, tpu.core_type = #tpu.core_type<tc>, window_params = [{transform_indices = @transform_0, window_bounds = array<i64: 8, 128>}, {transform_indices = @transform_1, window_bounds = array<i64: 128, 128>}, {transform_indices = @transform_2, window_bounds = array<i64: 1, 128>}, {transform_indices = @transform_3, window_bounds = array<i64: 8, 128>}]} {
    %c0 = arith.constant 0 : index
    %c0_0 = arith.constant 0 : index
    %0 = vector.load %arg3[%c0, %c0_0] : memref<8x128xf32, #tpu.memory_space<vmem>>, vector<8x128xf32>
    %c0_1 = arith.constant 0 : index
    %c0_2 = arith.constant 0 : index
    %1 = vector.load %arg4[%c0_1, %c0_2] : memref<128x128xf32, #tpu.memory_space<vmem>>, vector<128x128xf32>
    %cst = arith.constant dense<0.000000e+00> : vector<8x128xf32>
    %2 = tpu.matmul %0, %1, %cst {dimension_numbers = #tpu.dot_dimension_numbers<[1], [0], [0], [1], [0, 0, 1, 1], [], []>} : vector<8x128xf32>, vector<128x128xf32>, vector<8x128xf32> -> vector<8x128xf32>
    %c0_3 = arith.constant 0 : index
    %c0_4 = arith.constant 0 : index
    %3 = vector.load %arg5[%c0_3, %c0_4] : memref<1x128xf32, #tpu.memory_space<vmem>>, vector<1x128xf32>
    %4 = vector.broadcast %3 : vector<1x128xf32> to vector<8x128xf32>
    %5 = arith.addf %2, %4 : vector<8x128xf32>
    %c0_5 = arith.constant 0 : index
    %c0_6 = arith.constant 0 : index
    %6 = vector.load %arg6[%c0_5, %c0_6] : memref<8x128xf32, #tpu.memory_space<vmem>>, vector<8x128xf32>
    tpu.vector_store %arg6[%c0_5, %c0_6], %5 {strides = array<i32>} : memref<8x128xf32, #tpu.memory_space<vmem>>, vector<8x128xf32>,
    return
  }
  func.func @transform_0(%arg0: i32, %arg1: i32, %arg2: i32) -> (i32, i32) {
    %c0_i32 = arith.constant 0 : i32
    return %arg0, %arg2 : i32, i32
  }
  func.func @transform_1(%arg0: i32, %arg1: i32, %arg2: i32) -> (i32, i32) {
    %c0_i32 = arith.constant 0 : i32
    return %arg2, %arg1 : i32, i32
  }
  func.func @transform_2(%arg0: i32, %arg1: i32, %arg2: i32) -> (i32, i32) {
    %c0_i32 = arith.constant 0 : i32
    %c0_i32_0 = arith.constant 0 : i32
    return %c0_i32, %arg1 : i32, i32
  }
  func.func @transform_3(%arg0: i32, %arg1: i32, %arg2: i32) -> (i32, i32) {
    %c0_i32 = arith.constant 0 : i32
    return %arg0, %arg1 : i32, i32
  }
}

</mosaic_0001>

<bundles_post_ra>
// kernel: forward.1
= control target key start
LH: loop header
LB: loop body
LE: loop exit
PB: predicated region body
PF: predicated region fallthrough
CT: control target
= control target key end

     0   :  { %8 = vsyncpa [#allocation3], 0  ;;  %s328_s0 = inlined_call_operand.vmem [shape: f32[8,128], index: 0, kind: input, shape index: {}]   ;;  %s329_s1 = inlined_call_operand.hbm [shape: f32[128,128], index: 1, kind: input, shape index: {}]   ;;  %s330_s2 = inlined_call_operand.vmem [shape: f32[1,128], index: 2, kind: input, shape index: {}]   ;;  %s331_s3 = inlined_call_operand.hbm [shape: f32[8,128], index: 3, kind: output, shape index: {}]  }
   0x1   :  { %9 = vsyncpa [#allocation4], 0  ;;  %s271_s12 = smov [#allocation2]   ;;  %s223_s16 = scalar_lea.hbm %s329_s1, 2048 }
   0x2   :  { %s17_s13 = sshll.u32 %s271_s12, 4  ;;  %p224_p0 = scmp.ne.s32.totalorder %s329_s1, %s223_s16  ;;  %s18_s13 = int_to_ptr.vmem [resolvable:$true] %s17_s13 }
   0x3   :  { %p227_p1 = scmp.lt.u32.totalorder %s223_s16, %s329_s1 }
   0x5   :  { %p229_p2 = pnand %p227_p1, %p224_p0 }
   0x7   :  { %232 = shalt.err (!%p229_p2)
}
   0x8   :  { %s233_s21 = scalar_lea.vmem %s18_s13, 2048  ;;  %p238_p4 = scmp.lt.s32.totalorder %s18_s13, %s18_s13 }
   0x9   :  { %p234_p3 = scmp.ne.s32.totalorder %s18_s13, %s233_s21  ;;  %p239_p5 = scmp.lt.s32.totalorder %s233_s21, %s233_s21 }
   0xb   :  { %p240_p6 = por %p239_p5, %p238_p4 }
   0xd   :  { %p241_p7 = pnand %p240_p6, %p234_p3 }
   0xf   :  { %244 = shalt.err (!%p241_p7)
}
  0x10   :  { %s272_s22 = smov 128   ;;  %s273_s23 = smov 8  }
  0x11   :  { %23 = dma.hbm_to_vmem [thread:$0]  %s329_s1, 2048, %s18_s13, [#allocation3], %s272_s22, %s272_s22, %s273_s23  }
  0x12   :  { %267 = dma.done.wait [#allocation3], 2048  }
  0x13   :  { %268 = vsyncadd [#allocation3], 4294965248  ;;  %v274_v0 = vmov 0.0|0.0   ;;  %vm275_vm0 = vmmov 0   ;;  %v276_v1 = vmov 0.0   ;;  %v30_v2 = vld [vmem:[#allocation2] sm:$0xff] }
  0x14   :  { %192 = vmatprep.subr.bf16.mxu0 %v274_v0  ;;  %189 = vmatprep.mubr.msk.f32.mxu0 %vm275_vm0, %v276_v1  ;;  %v31_v3 = vld [vmem:[#allocation2 + $0x8] sm:$0xff]  ;;  %v32_v4 = vld [vmem:[#allocation2 + $0x10] sm:$0xff]  ;;  %v33_v6 = vld [vmem:[#allocation2 + $0x18] sm:$0xff]  ;;  %s277_s29 = smov [#allocation5]  }
  0x15   :  { %v193_v5 = vpack.c.bf16 %v31_v3, %v30_v2  ;;  %v196_v7 = vpack.c.bf16 %v33_v6, %v32_v4  ;;  %v34_v8 = vld [vmem:[#allocation2 + $0x20] sm:$0xff]  ;;  %v35_v9 = vld [vmem:[#allocation2 + $0x28] sm:$0xff]  ;;  %v36_v11 = vld [vmem:[#allocation2 + $0x30] sm:$0xff]  ;;  %s130_s30 = sshll.u32 %s277_s29, 4  ;;  %s131_s30 = int_to_ptr.vmem [resolvable:$true] %s130_s30 }
  0x16   :  { %v199_v10 = vpack.c.bf16 %v35_v9, %v34_v8  ;;  %v37_v12 = vld [vmem:[#allocation2 + $0x38] sm:$0xff]  ;;  %v38_v14 = vld [vmem:[#allocation2 + $0x40] sm:$0xff]  ;;  %v39_v15 = vld [vmem:[#allocation2 + $0x48] sm:$0xff]  ;;  %s245_s4 = scalar_lea.vmem %s131_s30, 128  ;;  %p250_p9 = scmp.lt.s32.totalorder %s131_s30, %s131_s30 }
  0x17   :  { %194 = vmatpush3.bf16.msra.mxu0 %v193_v5  ;;  %v202_v13 = vpack.c.bf16 %v37_v12, %v36_v11  ;;  %v205_v16 = vpack.c.bf16 %v39_v15, %v38_v14  ;;  %v40_v17 = vld [vmem:[#allocation2 + $0x50] sm:$0xff]  ;;  %v41_v18 = vld [vmem:[#allocation2 + $0x58] sm:$0xff]  ;;  %v42_v20 = vld [vmem:[#allocation2 + $0x60] sm:$0xff]  ;;  %p246_p8 = scmp.ne.s32.totalorder %s131_s30, %s245_s4  ;;  %p251_p10 = scmp.lt.s32.totalorder %s245_s4, %s245_s4 }
  0x18   :  { %195 = vmatprep.subr.bf16.mxu0 %v274_v0  ;;  %v208_v19 = vpack.c.bf16 %v41_v18, %v40_v17  ;;  %v43_v21 = vld [vmem:[#allocation2 + $0x68] sm:$0xff]  ;;  %v44_v23 = vld [vmem:[#allocation2 + $0x70] sm:$0xff]  ;;  %v45_v24 = vld [vmem:[#allocation2 + $0x78] sm:$0xff] }
  0x19   :  { %v211_v22 = vpack.c.bf16 %v43_v21, %v42_v20  ;;  %v214_v25 = vpack.c.bf16 %v45_v24, %v44_v23  ;;  %v29_v26 = vld [vmem:[%s328_s0] sm:$0xff]  ;;  %p252_p11 = por %p251_p10, %p250_p9 }
  0x1a   :  { %v139_v27 = vld [vmem:[%s330_s2] ss:$0 sm:$0xff] }
  0x1b   :  { %197 = vmatpush3.bf16.msra.mxu0 %v196_v7  ;;  %p253_p12 = pnand %p252_p11, %p246_p8 }
  0x1c   :  { %198 = vmatprep.subr.bf16.mxu0 %v274_v0 }
  0x1f   :  { %200 = vmatpush3.bf16.msra.mxu0 %v199_v10 }
  0x20   :  { %201 = vmatprep.subr.bf16.mxu0 %v274_v0 }
  0x23   :  { %203 = vmatpush3.bf16.msra.mxu0 %v202_v13 }
  0x24   :  { %204 = vmatprep.subr.bf16.mxu0 %v274_v0 }
  0x27   :  { %206 = vmatpush3.bf16.msra.mxu0 %v205_v16 }
  0x28   :  { %207 = vmatprep.subr.bf16.mxu0 %v274_v0 }
  0x2b   :  { %209 = vmatpush3.bf16.msra.mxu0 %v208_v19 }
  0x2c   :  { %210 = vmatprep.subr.bf16.mxu0 %v274_v0 }
  0x2f   :  { %212 = vmatpush3.bf16.msra.mxu0 %v211_v22 }
  0x30   :  { %213 = vmatprep.subr.bf16.mxu0 %v274_v0 }
  0x33   :  { %215 = vmatpush3.bf16.msra.mxu0 %v214_v25 }
  0x36   :  { %190 = vmatmul.mubr.f32.vlgmr.msra.gmra.mrb[0].mxu0 %v29_v26 }
 0x109   :  { %v119_v28 = vpop.f32.mrb[0].mxu0 }
 0x10a   :  { %v120_v29 = vadd.f32 %v139_v27, %v119_v28  ;;  %v191_v30 = vpop.f32.mrb[1].mxu0 }
 0x10c   :  { %123 = vst [vmem:[#allocation5] sm:$0xff] %v120_v29 }
 0x10d   :  { %256 = shalt.err (!%p253_p12)
}
 0x10e   :  { %s257_s6 = scalar_lea.hbm %s331_s3, 128 }
 0x10f   :  { %p258_p13 = scmp.ne.s32.totalorder %s331_s3, %s257_s6  ;;  %p261_p0 = scmp.lt.u32.totalorder %s257_s6, %s331_s3 }
 0x111   :  { %p263_p1 = pnand %p261_p0, %p258_p13 }
 0x113   :  { %266 = shalt.err (!%p263_p1)
}
 0x114   :  { %133 = dma.vmem_to_hbm [thread:$0]  %s131_s30, 128, %s331_s3, [#allocation4]  }
 0x115   :  { %269 = dma.done.wait [#allocation4], 128  }
 0x116   :  { %270 = vsyncadd [#allocation4], 4294967168 }
 0x117   :  { %137 = vsyncpa [#allocation3], 1 }
 0x118   :  { %138 = vsyncpa [#allocation4], 1 }

</bundles_post_ra>
